<compile_context>
chip_gen: v7x
topology: tpu7x:2x2x1
jax: 0.10.0
libtpu: 0.0.40
codegen_flags: <defaults>
</compile_context>

<pallas_src>
import math

import jax
import jax.numpy as jnp
from jax.experimental import pallas as pl
from jax.experimental.pallas import tpu as pltpu

D_MODEL = 32
HEADS = 4
D_K = D_MODEL // HEADS
D_FF = 256
EPS = 1e-6


def _norm(x, alpha, bias):
    """Matches torch Norm.forward: alpha*(x-mean)/(std+eps)+bias, unbiased std."""
    m = jnp.mean(x, axis=-1, keepdims=True)
    c = x - m
    var = jnp.sum(c * c, axis=-1, keepdims=True) * (1.0 / (x.shape[-1] - 1))
    std = jnp.sqrt(var)
    return alpha * c / (std + EPS) + bias


def prepare_params(p):
    """One-time parameter prep (hoisted out of the per-call hot path):
      * QKV weights/biases fused into a single (D, 3D) / (1, 3D) block so the
        kernel runs one projection matmul and the wrapper no longer pays a
        per-call concatenate.
      * Matmul weights cast to bf16 once (MXU-native on v5e/v6e/v7x); biases
        and norm params stay f32 so all VPU/EUP math remains f32.
    """
    f = jnp.bfloat16
    return {
        "wqkv": jnp.concatenate([p["wq"], p["wk"], p["wv"]], axis=1).astype(f),
        "bqkv": jnp.concatenate([p["bq"], p["bk"], p["bv"]], axis=1),
        "wo": p["wo"].astype(f), "bo": p["bo"],
        "a1": p["a1"], "g1": p["g1"], "a2": p["a2"], "g2": p["g2"],
        "w1": p["w1"].astype(f), "b1": p["b1"],
        "w2": p["w2"].astype(f), "b2": p["b2"],
    }


def encoder_layer(x, prep):
    B, S, D = x.shape
    assert D == D_MODEL
    BS = B * S
    scale = 1.0 / math.sqrt(D_K)

    weights = [prep["wqkv"], prep["bqkv"], prep["wo"], prep["bo"],
               prep["a1"], prep["g1"], prep["a2"], prep["g2"],
               prep["w1"], prep["b1"], prep["w2"], prep["b2"]]

    def kernel(x_ref, wqkv_ref, bqkv_ref, wo_ref, bo_ref,
               a1_ref, g1_ref, a2_ref, g2_ref,
               w1_ref, b1_ref, w2_ref, b2_ref, o_ref):
        xf = x_ref[...]                                       # (BS, D) f32

        # Hoisted single loads of the (1, N) parameters.
        a1 = a1_ref[...]; g1 = g1_ref[...]
        a2 = a2_ref[...]; g2 = g2_ref[...]
        bqkv = bqkv_ref[...]; bo = bo_ref[...]
        b1 = b1_ref[...]; b2 = b2_ref[...]

        # ---- sublayer 1: pre-norm multi-head self-attention + residual ----
        x2 = _norm(xf, a1, g1)                                # f32, exact divide
        qkv = jnp.dot(x2.astype(jnp.bfloat16), wqkv_ref[...],
                      preferred_element_type=jnp.float32) + bqkv   # (BS, 3D) f32

        # Head-major relayout: (BS, 3D) -> three (H*B, S, D_K) tensors so the
        # whole attention is 2 batched einsums (n = H*B = 8) instead of
        # 2*HEADS tiny per-head matmuls.
        # TODO(synk): fold the per-head lane slices into a single
        # pltpu.einshape relayout once that (lane -> batch) permutation form
        # is verified to lower for this shape.
        def to_heads(col0):
            blocks = [qkv[:, col0 + h * D_K: col0 + (h + 1) * D_K]
                      for h in range(HEADS)]                  # HEADS x (BS, D_K)
            return jnp.stack(blocks, axis=0).reshape(HEADS * B, S, D_K)

        qh = to_heads(0).astype(jnp.bfloat16)
        kh = to_heads(D_MODEL).astype(jnp.bfloat16)
        vh = to_heads(2 * D_MODEL).astype(jnp.bfloat16)

        s = jnp.einsum("nqd,nkd->nqk", qh, kh,
                       preferred_element_type=jnp.float32) * scale
        s = s - jnp.max(s, axis=-1, keepdims=True)
        p = jnp.exp(s)
        p = p * pl.reciprocal(jnp.sum(p, axis=-1, keepdims=True), approx=True)
        # TODO(synk): attention-score dropout is identity in eval mode.
        ctx = jnp.einsum("nqk,nkd->nqd", p.astype(jnp.bfloat16), vh,
                         preferred_element_type=jnp.float32)  # (H*B, S, D_K)

        ctx = ctx.reshape(HEADS, BS, D_K)
        concat = jnp.concatenate([ctx[h] for h in range(HEADS)], axis=-1)  # (BS, D)

        attn = jnp.dot(concat.astype(jnp.bfloat16), wo_ref[...],
                       preferred_element_type=jnp.float32) + bo
        xr = xf + attn                                        # dropout_1 == id (eval)

        # ---- sublayer 2: pre-norm feed-forward + residual ----
        x2b = _norm(xr, a2, g2)
        h1 = jnp.dot(x2b.astype(jnp.bfloat16), w1_ref[...],
                     preferred_element_type=jnp.float32) + b1
        h1 = jnp.maximum(h1, 0.0)                             # ReLU (FF dropout == id)
        ff = jnp.dot(h1.astype(jnp.bfloat16), w2_ref[...],
                     preferred_element_type=jnp.float32) + b2
        o_ref[...] = xr + ff                                  # dropout_2 == id (eval)

    x_flat = x.reshape(BS, D)
    vmem = pl.BlockSpec(memory_space=pltpu.MemorySpace.VMEM)

    # Gridless call: whole (16, 32) problem in one kernel invocation with every
    # operand VMEM-resident -- no single-step pipeline, no double-buffered
    # weight DMAs, no prologue/epilogue overhead.
    # TODO(synk): if B*S grows, reintroduce a row-tiled "parallel" grid axis
    # (2 TCs on v7x), size tiles against v7x's 64 MiB VMEM, and set
    # vmem_limit_bytes explicitly for v5e's 16 MiB scoped default.
    out = pl.pallas_call(
        kernel,
        out_shape=jax.ShapeDtypeStruct((BS, D), jnp.float32),
        in_specs=[vmem] * (1 + len(weights)),
        out_specs=vmem,
    )(x_flat, *weights)

    return out.reshape(B, S, D)


def encoder_layer_ref(x, p):
    """Pure-JAX reference mirroring the PyTorch forward (eval mode)."""
    x2 = _norm(x, p["a1"][0], p["g1"][0])
    q = x2 @ p["wq"] + p["bq"][0]
    k = x2 @ p["wk"] + p["bk"][0]
    v = x2 @ p["wv"] + p["bv"][0]
    B, S, _ = x.shape
    qh = q.reshape(B, S, HEADS, D_K).transpose(0, 2, 1, 3)
    kh = k.reshape(B, S, HEADS, D_K).transpose(0, 2, 1, 3)
    vh = v.reshape(B, S, HEADS, D_K).transpose(0, 2, 1, 3)
    scores = jnp.einsum("bhsd,bhtd->bhst", qh, kh) / math.sqrt(D_K)
    scores = jax.nn.softmax(scores, axis=-1)
    out = jnp.einsum("bhst,bhtd->bhsd", scores, vh)
    concat = out.transpose(0, 2, 1, 3).reshape(B, S, D_MODEL)
    x = x + (concat @ p["wo"] + p["bo"][0])
    x2 = _norm(x, p["a2"][0], p["g2"][0])
    ff = jnp.maximum(x2 @ p["w1"] + p["b1"][0], 0.0) @ p["w2"] + p["b2"][0]
    return x + ff


def make_params(key):
    ks = jax.random.split(key, 16)
    s = 0.1

    def rnd(k, shape):
        return s * jax.random.normal(k, shape, dtype=jnp.float32)

    return {
        "wq": rnd(ks[0], (D_MODEL, D_MODEL)), "bq": rnd(ks[1], (1, D_MODEL)),
        "wk": rnd(ks[2], (D_MODEL, D_MODEL)), "bk": rnd(ks[3], (1, D_MODEL)),
        "wv": rnd(ks[4], (D_MODEL, D_MODEL)), "bv": rnd(ks[5], (1, D_MODEL)),
        "wo": rnd(ks[6], (D_MODEL, D_MODEL)), "bo": rnd(ks[7], (1, D_MODEL)),
        "a1": jnp.ones((1, D_MODEL), jnp.float32),
        "g1": jnp.zeros((1, D_MODEL), jnp.float32),
        "a2": jnp.ones((1, D_MODEL), jnp.float32),
        "g2": jnp.zeros((1, D_MODEL), jnp.float32),
        "w1": rnd(ks[8], (D_MODEL, D_FF)), "b1": rnd(ks[9], (1, D_FF)),
        "w2": rnd(ks[10], (D_FF, D_MODEL)), "b2": rnd(ks[11], (1, D_MODEL)),
    }


if __name__ == "__main__":
    key = jax.random.PRNGKey(0)
    kx, kp = jax.random.split(key)
    B, S = 2, 8
    x = jax.random.normal(kx, (B, S, D_MODEL), dtype=jnp.float32)
    params = make_params(kp)
    prep = prepare_params(params)          # one-time fuse + bf16 cast

    out = jax.block_until_ready(encoder_layer(x, prep))
    ref = encoder_layer_ref(x, params)

    assert out.shape == (B, S, D_MODEL)
    assert jnp.allclose(out, ref, rtol=1e-2, atol=1e-2), "mismatch vs reference"

    print("KERNEL_OK")
</pallas_src>

<mosaic_0001>
module attributes {stable_mosaic.version = 11 : i64} {
  func.func @kernel(%arg0: memref<16x32xf32, #tpu.memory_space<vmem>>, %arg1: memref<32x96xbf16, #tpu.memory_space<vmem>>, %arg2: memref<1x96xf32, #tpu.memory_space<vmem>>, %arg3: memref<32x32xbf16, #tpu.memory_space<vmem>>, %arg4: memref<1x32xf32, #tpu.memory_space<vmem>>, %arg5: memref<1x32xf32, #tpu.memory_space<vmem>>, %arg6: memref<1x32xf32, #tpu.memory_space<vmem>>, %arg7: memref<1x32xf32, #tpu.memory_space<vmem>>, %arg8: memref<1x32xf32, #tpu.memory_space<vmem>>, %arg9: memref<32x256xbf16, #tpu.memory_space<vmem>>, %arg10: memref<1x256xf32, #tpu.memory_space<vmem>>, %arg11: memref<256x32xbf16, #tpu.memory_space<vmem>>, %arg12: memref<1x32xf32, #tpu.memory_space<vmem>>, %arg13: memref<16x32xf32, #tpu.memory_space<vmem>>) attributes {dimension_semantics = [], scalar_prefetch = 0 : i64, scratch_operands = 0 : i64, tpu.core_type = #tpu.core_type<tc>} {
    %c0 = arith.constant 0 : index
    %c0_0 = arith.constant 0 : index
    %0 = vector.load %arg0[%c0, %c0_0] : memref<16x32xf32, #tpu.memory_space<vmem>>, vector<16x32xf32>
    %c0_1 = arith.constant 0 : index
    %c0_2 = arith.constant 0 : index
    %1 = vector.load %arg5[%c0_1, %c0_2] : memref<1x32xf32, #tpu.memory_space<vmem>>, vector<1x32xf32>
    %c0_3 = arith.constant 0 : index
    %c0_4 = arith.constant 0 : index
    %2 = vector.load %arg6[%c0_3, %c0_4] : memref<1x32xf32, #tpu.memory_space<vmem>>, vector<1x32xf32>
    %c0_5 = arith.constant 0 : index
    %c0_6 = arith.constant 0 : index
    %3 = vector.load %arg7[%c0_5, %c0_6] : memref<1x32xf32, #tpu.memory_space<vmem>>, vector<1x32xf32>
    %c0_7 = arith.constant 0 : index
    %c0_8 = arith.constant 0 : index
    %4 = vector.load %arg8[%c0_7, %c0_8] : memref<1x32xf32, #tpu.memory_space<vmem>>, vector<1x32xf32>
    %c0_9 = arith.constant 0 : index
    %c0_10 = arith.constant 0 : index
    %5 = vector.load %arg2[%c0_9, %c0_10] : memref<1x96xf32, #tpu.memory_space<vmem>>, vector<1x96xf32>
    %c0_11 = arith.constant 0 : index
    %c0_12 = arith.constant 0 : index
    %6 = vector.load %arg4[%c0_11, %c0_12] : memref<1x32xf32, #tpu.memory_space<vmem>>, vector<1x32xf32>
    %c0_13 = arith.constant 0 : index
    %c0_14 = arith.constant 0 : index
    %7 = vector.load %arg10[%c0_13, %c0_14] : memref<1x256xf32, #tpu.memory_space<vmem>>, vector<1x256xf32>
    %c0_15 = arith.constant 0 : index
    %c0_16 = arith.constant 0 : index
    %8 = vector.load %arg12[%c0_15, %c0_16] : memref<1x32xf32, #tpu.memory_space<vmem>>, vector<1x32xf32>
    %cst = arith.constant dense<0.000000e+00> : vector<16xf32>
    %9 = vector.multi_reduction <add>, %0, %cst [1] : vector<16x32xf32> to vector<16xf32>
    %10 = vector.shape_cast %9 : vector<16xf32> to vector<16x1xf32>
    %cst_17 = arith.constant 3.200000e+01 : f32
    %11 = vector.broadcast %cst_17 : f32 to vector<16x1xf32>
    %12 = arith.divf %10, %11 : vector<16x1xf32>
    %13 = vector.broadcast %12 : vector<16x1xf32> to vector<16x32xf32>
    %14 = arith.subf %0, %13 : vector<16x32xf32>
    %15 = arith.mulf %14, %14 : vector<16x32xf32>
    %cst_18 = arith.constant dense<0.000000e+00> : vector<16xf32>
    %16 = vector.multi_reduction <add>, %15, %cst_18 [1] : vector<16x32xf32> to vector<16xf32>
    %17 = vector.shape_cast %16 : vector<16xf32> to vector<16x1xf32>
    %cst_19 = arith.constant 0.0322580636 : f32
    %18 = vector.broadcast %cst_19 : f32 to vector<16x1xf32>
    %19 = arith.mulf %17, %18 : vector<16x1xf32>
    %20 = math.sqrt %19 : vector<16x1xf32>
    %21 = vector.broadcast %1 : vector<1x32xf32> to vector<16x32xf32>
    %22 = arith.mulf %21, %14 : vector<16x32xf32>
    %cst_20 = arith.constant 9.99999997E-7 : f32
    %23 = vector.broadcast %cst_20 : f32 to vector<16x1xf32>
    %24 = arith.addf %20, %23 : vector<16x1xf32>
    %25 = vector.broadcast %24 : vector<16x1xf32> to vector<16x32xf32>
    %26 = arith.divf %22, %25 : vector<16x32xf32>
    %27 = vector.broadcast %2 : vector<1x32xf32> to vector<16x32xf32>
    %28 = arith.addf %26, %27 : vector<16x32xf32>
    %29 = arith.truncf %28 : vector<16x32xf32> to vector<16x32xbf16>
    %c0_21 = arith.constant 0 : index
    %c0_22 = arith.constant 0 : index
    %30 = vector.load %arg1[%c0_21, %c0_22] : memref<32x96xbf16, #tpu.memory_space<vmem>>, vector<32x96xbf16>
    %cst_23 = arith.constant dense<0.000000e+00> : vector<16x96xf32>
    %31 = tpu.matmul %29, %30, %cst_23 {dimension_numbers = #tpu.dot_dimension_numbers<[1], [0], [0], [1], [0, 0, 1, 1], [], []>} : vector<16x32xbf16>, vector<32x96xbf16>, vector<16x96xf32> -> vector<16x96xf32>
    %32 = vector.broadcast %5 : vector<1x96xf32> to vector<16x96xf32>
    %33 = arith.addf %31, %32 : vector<16x96xf32>
    %34 = vector.extract_strided_slice %33 {offsets = [0, 0], sizes = [16, 8], strides = [1, 1]} : vector<16x96xf32> to vector<16x8xf32>
    %35 = vector.extract_strided_slice %33 {offsets = [0, 8], sizes = [16, 8], strides = [1, 1]} : vector<16x96xf32> to vector<16x8xf32>
    %36 = vector.extract_strided_slice %33 {offsets = [0, 16], sizes = [16, 8], strides = [1, 1]} : vector<16x96xf32> to vector<16x8xf32>
    %37 = vector.extract_strided_slice %33 {offsets = [0, 24], sizes = [16, 8], strides = [1, 1]} : vector<16x96xf32> to vector<16x8xf32>
    %38 = vector.shape_cast %34 : vector<16x8xf32> to vector<1x16x8xf32>
    %39 = vector.shape_cast %35 : vector<16x8xf32> to vector<1x16x8xf32>
    %40 = vector.shape_cast %36 : vector<16x8xf32> to vector<1x16x8xf32>
    %41 = vector.shape_cast %37 : vector<16x8xf32> to vector<1x16x8xf32>
    %42 = tpu.concatenate %38, %39, %40, %41 in 0 : vector<1x16x8xf32>, vector<1x16x8xf32>, vector<1x16x8xf32>, vector<1x16x8xf32> -> vector<4x16x8xf32>
    %43 = vector.shape_cast %42 : vector<4x16x8xf32> to vector<8x8x8xf32>
    %44 = arith.truncf %43 : vector<8x8x8xf32> to vector<8x8x8xbf16>
    %45 = vector.extract_strided_slice %33 {offsets = [0, 32], sizes = [16, 8], strides = [1, 1]} : vector<16x96xf32> to vector<16x8xf32>
    %46 = vector.extract_strided_slice %33 {offsets = [0, 40], sizes = [16, 8], strides = [1, 1]} : vector<16x96xf32> to vector<16x8xf32>
    %47 = vector.extract_strided_slice %33 {offsets = [0, 48], sizes = [16, 8], strides = [1, 1]} : vector<16x96xf32> to vector<16x8xf32>
    %48 = vector.extract_strided_slice %33 {offsets = [0, 56], sizes = [16, 8], strides = [1, 1]} : vector<16x96xf32> to vector<16x8xf32>
    %49 = vector.shape_cast %45 : vector<16x8xf32> to vector<1x16x8xf32>
    %50 = vector.shape_cast %46 : vector<16x8xf32> to vector<1x16x8xf32>
    %51 = vector.shape_cast %47 : vector<16x8xf32> to vector<1x16x8xf32>
    %52 = vector.shape_cast %48 : vector<16x8xf32> to vector<1x16x8xf32>
    %53 = tpu.concatenate %49, %50, %51, %52 in 0 : vector<1x16x8xf32>, vector<1x16x8xf32>, vector<1x16x8xf32>, vector<1x16x8xf32> -> vector<4x16x8xf32>
    %54 = vector.shape_cast %53 : vector<4x16x8xf32> to vector<8x8x8xf32>
    %55 = arith.truncf %54 : vector<8x8x8xf32> to vector<8x8x8xbf16>
    %56 = vector.extract_strided_slice %33 {offsets = [0, 64], sizes = [16, 8], strides = [1, 1]} : vector<16x96xf32> to vector<16x8xf32>
    %57 = vector.extract_strided_slice %33 {offsets = [0, 72], sizes = [16, 8], strides = [1, 1]} : vector<16x96xf32> to vector<16x8xf32>
    %58 = vector.extract_strided_slice %33 {offsets = [0, 80], sizes = [16, 8], strides = [1, 1]} : vector<16x96xf32> to vector<16x8xf32>
    %59 = vector.extract_strided_slice %33 {offsets = [0, 88], sizes = [16, 8], strides = [1, 1]} : vector<16x96xf32> to vector<16x8xf32>
    %60 = vector.shape_cast %56 : vector<16x8xf32> to vector<1x16x8xf32>
    %61 = vector.shape_cast %57 : vector<16x8xf32> to vector<1x16x8xf32>
    %62 = vector.shape_cast %58 : vector<16x8xf32> to vector<1x16x8xf32>
    %63 = vector.shape_cast %59 : vector<16x8xf32> to vector<1x16x8xf32>
    %64 = tpu.concatenate %60, %61, %62, %63 in 0 : vector<1x16x8xf32>, vector<1x16x8xf32>, vector<1x16x8xf32>, vector<1x16x8xf32> -> vector<4x16x8xf32>
    %65 = vector.shape_cast %64 : vector<4x16x8xf32> to vector<8x8x8xf32>
    %66 = arith.truncf %65 : vector<8x8x8xf32> to vector<8x8x8xbf16>
    "tpu.trace_start"() <{level = 10 : i32, message = "nqd,nkd->nqk"}> : () -> ()
    %cst_24 = arith.constant dense<0.000000e+00> : vector<8x8x8xf32>
    %67 = tpu.matmul %44, %55, %cst_24 {dimension_numbers = #tpu.dot_dimension_numbers<[2], [2], [1], [1], [0, 0, 0, 1, 1, 1], [0], [0]>} : vector<8x8x8xbf16>, vector<8x8x8xbf16>, vector<8x8x8xf32> -> vector<8x8x8xf32>
    "tpu.trace_stop"() : () -> ()
    %cst_25 = arith.constant 0.353553385 : f32
    %68 = vector.broadcast %cst_25 : f32 to vector<8x8x8xf32>
    %69 = arith.mulf %67, %68 : vector<8x8x8xf32>
    %cst_26 = arith.constant dense<0xFF800000> : vector<8x8xf32>
    %70 = vector.multi_reduction <maximumf>, %69, %cst_26 [2] : vector<8x8x8xf32> to vector<8x8xf32>
    %71 = vector.shape_cast %70 : vector<8x8xf32> to vector<8x8x1xf32>
    %72 = vector.broadcast %71 : vector<8x8x1xf32> to vector<8x8x8xf32>
    %73 = arith.subf %69, %72 : vector<8x8x8xf32>
    %74 = math.exp %73 : vector<8x8x8xf32>
    %cst_27 = arith.constant dense<0.000000e+00> : vector<8x8xf32>
    %75 = vector.multi_reduction <add>, %74, %cst_27 [2] : vector<8x8x8xf32> to vector<8x8xf32>
    %76 = vector.shape_cast %75 : vector<8x8xf32> to vector<8x8x1xf32>
    %77 = tpu.reciprocal %76 {approx = true} : vector<8x8x1xf32> -> vector<8x8x1xf32>
    %78 = vector.broadcast %77 : vector<8x8x1xf32> to vector<8x8x8xf32>
    %79 = arith.mulf %74, %78 : vector<8x8x8xf32>
    %80 = arith.truncf %79 : vector<8x8x8xf32> to vector<8x8x8xbf16>
    "tpu.trace_start"() <{level = 10 : i32, message = "nqk,nkd->nqd"}> : () -> ()
    %cst_28 = arith.constant dense<0.000000e+00> : vector<8x8x8xf32>
    %81 = tpu.matmul %80, %66, %cst_28 {dimension_numbers = #tpu.dot_dimension_numbers<[2], [1], [1], [2], [0, 0, 0, 1, 1, 2], [0], [0]>} : vector<8x8x8xbf16>, vector<8x8x8xbf16>, vector<8x8x8xf32> -> vector<8x8x8xf32>
    "tpu.trace_stop"() : () -> ()
    %82 = vector.shape_cast %81 : vector<8x8x8xf32> to vector<4x16x8xf32>
    %83 = vector.extract_strided_slice %82 {offsets = [0, 0, 0], sizes = [1, 16, 8], strides = [1, 1, 1]} : vector<4x16x8xf32> to vector<1x16x8xf32>
    %84 = vector.shape_cast %83 : vector<1x16x8xf32> to vector<16x8xf32>
    %85 = vector.extract_strided_slice %82 {offsets = [1, 0, 0], sizes = [1, 16, 8], strides = [1, 1, 1]} : vector<4x16x8xf32> to vector<1x16x8xf32>
    %86 = vector.shape_cast %85 : vector<1x16x8xf32> to vector<16x8xf32>
    %87 = vector.extract_strided_slice %82 {offsets = [2, 0, 0], sizes = [1, 16, 8], strides = [1, 1, 1]} : vector<4x16x8xf32> to vector<1x16x8xf32>
    %88 = vector.shape_cast %87 : vector<1x16x8xf32> to vector<16x8xf32>
    %89 = vector.extract_strided_slice %82 {offsets = [3, 0, 0], sizes = [1, 16, 8], strides = [1, 1, 1]} : vector<4x16x8xf32> to vector<1x16x8xf32>
    %90 = vector.shape_cast %89 : vector<1x16x8xf32> to vector<16x8xf32>
    %91 = tpu.concatenate %84, %86, %88, %90 in 1 : vector<16x8xf32>, vector<16x8xf32>, vector<16x8xf32>, vector<16x8xf32> -> vector<16x32xf32>
    %92 = arith.truncf %91 : vector<16x32xf32> to vector<16x32xbf16>
    %c0_29 = arith.constant 0 : index
    %c0_30 = arith.constant 0 : index
    %93 = vector.load %arg3[%c0_29, %c0_30] : memref<32x32xbf16, #tpu.memory_space<vmem>>, vector<32x32xbf16>
    %cst_31 = arith.constant dense<0.000000e+00> : vector<16x32xf32>
    %94 = tpu.matmul %92, %93, %cst_31 {dimension_numbers = #tpu.dot_dimension_numbers<[1], [0], [0], [1], [0, 0, 1, 1], [], []>} : vector<16x32xbf16>, vector<32x32xbf16>, vector<16x32xf32> -> vector<16x32xf32>
    %95 = vector.broadcast %6 : vector<1x32xf32> to vector<16x32xf32>
    %96 = arith.addf %94, %95 : vector<16x32xf32>
    %97 = arith.addf %0, %96 : vector<16x32xf32>
    %cst_32 = arith.constant dense<0.000000e+00> : vector<16xf32>
    %98 = vector.multi_reduction <add>, %97, %cst_32 [1] : vector<16x32xf32> to vector<16xf32>
    %99 = vector.shape_cast %98 : vector<16xf32> to vector<16x1xf32>
    %cst_33 = arith.constant 3.200000e+01 : f32
    %100 = vector.broadcast %cst_33 : f32 to vector<16x1xf32>
    %101 = arith.divf %99, %100 : vector<16x1xf32>
    %102 = vector.broadcast %101 : vector<16x1xf32> to vector<16x32xf32>
    %103 = arith.subf %97, %102 : vector<16x32xf32>
    %104 = arith.mulf %103, %103 : vector<16x32xf32>
    %cst_34 = arith.constant dense<0.000000e+00> : vector<16xf32>
    %105 = vector.multi_reduction <add>, %104, %cst_34 [1] : vector<16x32xf32> to vector<16xf32>
    %106 = vector.shape_cast %105 : vector<16xf32> to vector<16x1xf32>
    %cst_35 = arith.constant 0.0322580636 : f32
    %107 = vector.broadcast %cst_35 : f32 to vector<16x1xf32>
    %108 = arith.mulf %106, %107 : vector<16x1xf32>
    %109 = math.sqrt %108 : vector<16x1xf32>
    %110 = vector.broadcast %3 : vector<1x32xf32> to vector<16x32xf32>
    %111 = arith.mulf %110, %103 : vector<16x32xf32>
    %cst_36 = arith.constant 9.99999997E-7 : f32
    %112 = vector.broadcast %cst_36 : f32 to vector<16x1xf32>
    %113 = arith.addf %109, %112 : vector<16x1xf32>
    %114 = vector.broadcast %113 : vector<16x1xf32> to vector<16x32xf32>
    %115 = arith.divf %111, %114 : vector<16x32xf32>
    %116 = vector.broadcast %4 : vector<1x32xf32> to vector<16x32xf32>
    %117 = arith.addf %115, %116 : vector<16x32xf32>
    %118 = arith.truncf %117 : vector<16x32xf32> to vector<16x32xbf16>
    %c0_37 = arith.constant 0 : index
    %c0_38 = arith.constant 0 : index
    %119 = vector.load %arg9[%c0_37, %c0_38] : memref<32x256xbf16, #tpu.memory_space<vmem>>, vector<32x256xbf16>
    %cst_39 = arith.constant dense<0.000000e+00> : vector<16x256xf32>
    %120 = tpu.matmul %118, %119, %cst_39 {dimension_numbers = #tpu.dot_dimension_numbers<[1], [0], [0], [1], [0, 0, 1, 1], [], []>} : vector<16x32xbf16>, vector<32x256xbf16>, vector<16x256xf32> -> vector<16x256xf32>
    %121 = vector.broadcast %7 : vector<1x256xf32> to vector<16x256xf32>
    %122 = arith.addf %120, %121 : vector<16x256xf32>
    %cst_40 = arith.constant 0.000000e+00 : f32
    %123 = vector.broadcast %cst_40 : f32 to vector<16x256xf32>
    %124 = arith.maximumf %122, %123 : vector<16x256xf32>
    %125 = arith.truncf %124 : vector<16x256xf32> to vector<16x256xbf16>
    %c0_41 = arith.constant 0 : index
    %c0_42 = arith.constant 0 : index
    %126 = vector.load %arg11[%c0_41, %c0_42] : memref<256x32xbf16, #tpu.memory_space<vmem>>, vector<256x32xbf16>
    %cst_43 = arith.constant dense<0.000000e+00> : vector<16x32xf32>
    %127 = tpu.matmul %125, %126, %cst_43 {dimension_numbers = #tpu.dot_dimension_numbers<[1], [0], [0], [1], [0, 0, 1, 1], [], []>} : vector<16x256xbf16>, vector<256x32xbf16>, vector<16x32xf32> -> vector<16x32xf32>
    %128 = vector.broadcast %8 : vector<1x32xf32> to vector<16x32xf32>
    %129 = arith.addf %127, %128 : vector<16x32xf32>
    %130 = arith.addf %97, %129 : vector<16x32xf32>
    %c0_44 = arith.constant 0 : index
    %c0_45 = arith.constant 0 : index
    %131 = vector.load %arg13[%c0_44, %c0_45] : memref<16x32xf32, #tpu.memory_space<vmem>>, vector<16x32xf32>
    tpu.vector_store %arg13[%c0_44, %c0_45], %130 {strides = array<i32>} : memref<16x32xf32, #tpu.memory_space<vmem>>, vector<16x32xf32>,
    return
  }
}

</mosaic_0001>

<bundles_post_ra>
// kernel: tpu_custom_call.1
= control target key start
LH: loop header
LB: loop body
LE: loop exit
PB: predicated region body
PF: predicated region fallthrough
CT: control target
= control target key end

     0   :  { %vm56_vm0 = vcmask 261120   ;;  %s2325_s0 = inlined_call_operand.vmem [shape: f32[16,32], index: 0, kind: input, shape index: {}]   ;;  %s2326_s1 = inlined_call_operand.vmem [shape: bf16[32,96], index: 1, kind: input, shape index: {}]   ;;  %s2327_s2 = inlined_call_operand.vmem [shape: f32[1,96], index: 2, kind: input, shape index: {}]   ;;  %s2328_s3 = inlined_call_operand.vmem [shape: bf16[32,32], index: 3, kind: input, shape index: {}]   ;;  %s2329_s4 = inlined_call_operand.vmem [shape: f32[1,32], index: 4, kind: input, shape index: {}]   ;;  %s2330_s5 = inlined_call_operand.vmem [shape: f32[1,32], index: 5, kind: input, shape index: {}]   ;;  %s2331_s6 = inlined_call_operand.vmem [shape: f32[1,32], index: 6, kind: input, shape index: {}]   ;;  %s2332_s7 = inlined_call_operand.vmem [shape: f32[1,32], index: 7, kind: input, shape index: {}]   ;;  %s2333_s8 = inlined_call_operand.vmem [shape: f32[1,32], index: 8, kind: input, shape index: {}]   ;;  %s2334_s9 = inlined_call_operand.vmem [shape: bf16[32,256], index: 9, kind: input, shape index: {}]   ;;  %s2335_s10 = inlined_call_operand.vmem [shape: f32[1,256], index: 10, kind: input, shape index: {}]   ;;  %s2336_s11 = inlined_call_operand.vmem [shape: bf16[256,32], index: 11, kind: input, shape index: {}]   ;;  %s2337_s12 = inlined_call_operand.vmem [shape: f32[1,32], index: 12, kind: input, shape index: {}]   ;;  %s2338_s13 = inlined_call_operand.hbm [shape: f32[16,32], index: 13, kind: output, shape index: {}]  }
   0x1   :  { %v1980_v0 = vld [vmem:[%s2325_s0] sm:$0xff]  ;;  %v1985_v1 = vld [vmem:[%s2325_s0 + $0x8] sm:$0xff] }
   0x2   :  { %v57_v2 = vsel %vm56_vm0, %v1980_v0, 0.0  ;;  %v60_v3 = vsel %vm56_vm0, %v1985_v1, 0.0 }
   0x3   :  { %58 = vadd.xlane.f32.xlu0 %v57_v2 }
   0x7   :  { %61 = vadd.xlane.f32.xlu0 %v60_v3 }
   0x8   :  { %18 = vsyncpa [#allocation3], 0  ;;  %v1796_v14 = vld [vmem:[%s2326_s1] sm:$0xff]   ;;  %v1894_v15 = vmov 0.0   ;;  %vm1895_vm1 = vmmov 0   ;;  %v1797_v16 = vld [vmem:[%s2326_s1 + $0x8] sm:$0xff]  }
   0x9   :  { %1641 = vmatprep.subr.bf16.mxu0 %v1894_v15  ;;  %1645 = vmatprep.mubr.msk.bf16.mxu0 %vm1895_vm1, %v1894_v15  ;;  %v1531_v33 = vld [vmem:[%s2330_s5] ss:$0 sm:$0xff]  ;;  %s1897_s19 = smov 120   ;;  %s1898_s20 = smov 104   ;;  %vm212_vm6 = vcmask 64512   ;;  %vm711_vm7 = vcmask 1043456  }
   0xa   :  { %1642 = vmatpush3.bf16.msra.mxu0 %v1796_v14  ;;  %1661 = vmatprep.subr.bf16.mxu1 %v1894_v15  ;;  %v1532_v39 = vld [vmem:[%s2331_s6] ss:$0 sm:$0xff]  ;;  %s1896_s6 = smov 112   ;;  %s1899_s21 = smov 96   ;;  %vm1117_vm8 = vcmask 130048   ;;  %vm1120_vm9 = vcmask 195584  }
   0xb   :  { %1643 = vmatprep.subr.bf16.mxu0 %v1894_v15  ;;  %1663 = vmatprep.mubr.msk.bf16.mxu1 %vm1895_vm1, %v1894_v15  ;;  %v1533_v44 = vld [vmem:[%s2327_s2] ss:$0 sm:$0xff]  ;;  %s1900_s2 = smov 64   ;;  %s1901_s22 = smov 8  }
   0xc   :  { %s1902_s27 = smov 16   ;;  %s1903_s28 = smov 24  }
   0xe   :  { %1644 = vmatpush3.bf16.msra.mxu0 %v1797_v16 }
   0xf   :  { %1649 = vmatprep.subr.bf16.mxu0 %v1894_v15 }
  0x90   :  { %v59_v4 = vpop.xlane.xlu0 %58 }
  0x91   :  { %v64_v5 = vmul.f32 0.03125, %v59_v4 }
  0x93   :  { %v66_v6 = vsub.f32 %v1980_v0, %v64_v5 }
  0x94   :  { %v62_v7 = vpop.xlane.xlu0 %61 }
  0x95   :  { %v65_v8 = vmul.f32 0.03125, %v62_v7  ;;  %v68_v9 = vmul.f32 %v66_v6, %v66_v6  ;;  %v98_v35 = vmul.f32 %v1531_v33, %v66_v6 }
  0x97   :  { %v67_v10 = vsub.f32 %v1985_v1, %v65_v8  ;;  %v70_v11 = vsel %vm56_vm0, %v68_v9, 0.0 }
  0x98   :  { %71 = vadd.xlane.f32.xlu1 %v70_v11 }
  0x99   :  { %v69_v12 = vmul.f32 %v67_v10, %v67_v10  ;;  %v99_v36 = vmul.f32 %v1531_v33, %v67_v10 }
  0x9b   :  { %v73_v13 = vsel %vm56_vm0, %v69_v12, 0.0 }
  0x9c   :  { %74 = vadd.xlane.f32.xlu1 %v73_v13 }
 0x125   :  { %v72_v17 = vpop.xlane.xlu1 %71 }
 0x126   :  { %v76_v18 = vmul.f32 0.032258064, %v72_v17 }
 0x128   :  { %1822 = vrsqrt.f32 %v76_v18  ;;  %vm80_vm2 = vcmp.eq.f32.partialorder %v76_v18, inf  ;;  %v83_v23 = vand.u32 2147483648, %v76_v18  ;;  %vm82_vm3 = vcmp.eq.f32.partialorder %v76_v18, 0.0 }
 0x129   :  { %v75_v19 = vpop.xlane.xlu1 %74 }
 0x12a   :  { %v77_v20 = vmul.f32 0.032258064, %v75_v19 }
 0x12c   :  { %1824 = vrsqrt.f32 %v77_v20  ;;  %vm87_vm4 = vcmp.eq.f32.partialorder %v77_v20, inf  ;;  %v90_v29 = vand.u32 2147483648, %v77_v20  ;;  %vm89_vm5 = vcmp.eq.f32.partialorder %v77_v20, 0.0 }
 0x132   :  { %v1823_v21 = vpop.eup %1822 }
 0x133   :  { %v79_v22 = vmul.f32 %v1823_v21, %v76_v18 }
 0x135   :  { %v81_v24 = vsel %vm80_vm2, %v76_v18, %v79_v22 }
 0x136   :  { %v1825_v25 = vpop.eup %1824  ;;  %v84_v26 = vsel %vm82_vm3, %v83_v23, %v81_v24 }
 0x137   :  { %v100_v27 = vadd.f32 1e-06, %v84_v26  ;;  %v86_v28 = vmul.f32 %v1825_v25, %v77_v20 }
 0x139   :  { %1826 = vrcp.f32 %v100_v27  ;;  %v88_v30 = vsel %vm87_vm4, %v77_v20, %v86_v28 }
 0x13a   :  { %v91_v31 = vsel %vm89_vm5, %v90_v29, %v88_v30 }
 0x13b   :  { %v101_v32 = vadd.f32 1e-06, %v91_v31 }
 0x13d   :  { %1828 = vrcp.f32 %v101_v32 }
 0x143   :  { %v1827_v34 = vpop.eup %1826 }
 0x144   :  { %v103_v37 = vmul.f32 %v1827_v34, %v98_v35 }
 0x146   :  { %v112_v41 = vadd.f32 %v1532_v39, %v103_v37 }
 0x147   :  { %v1829_v38 = vpop.eup %1828 }
 0x148   :  { %v105_v40 = vmul.f32 %v1829_v38, %v99_v36 }
 0x14a   :  { %v113_v42 = vadd.f32 %v1532_v39, %v105_v40 }
 0x14c   :  { %v114_v43 = vpack.c.bf16 %v113_v42, %v112_v41 }
 0x14e   :  { %1646 = vmatmul.mubr.msk.bf16.vlgmr.msra.gmra.mrb[0].mxu0 %vm56_vm0, %v114_v43 }
 0x14f   :  { %1651 = vmatprep.mubr.msk.bf16.mxu0 %vm1895_vm1, %v1894_v15 }
 0x221   :  { %v174_v45 = vpop.f32.mrb[0].mxu0 }
 0x222   :  { %v1647_v46 = vpop.f32.mrb[1].mxu0  ;;  %v175_v48 = vadd.f32 %v1533_v44, %v174_v45 }
 0x223   :  { %v177_v47 = vpop.f32.mrb[2].mxu0 }
 0x224   :  { %v178_v49 = vadd.f32 %v1533_v44, %v177_v47  ;;  %v1648_v50 = vpop.f32.mrb[3].mxu0  ;;  %v201_v53 = vpack.c.bf16 %v175_v48, %v175_v48 }
 0x226   :  { %v1771_v51 = vpack.i.bf16 %v178_v49, %v175_v48  ;;  %v2021_v52 = vpack.c.bf16 %v178_v49, %v178_v49 }
 0x228   :  { %1772 = vrot.lane.b32.xlu1 %v1771_v51, %s1896_s6  ;;  %1767 = vrot.lane.b32.xlu0 %v1771_v51, %s1897_s19 }
 0x22c   :  { %1777 = vrot.lane.b32.xlu1 %v1771_v51, %s1898_s20  ;;  %260 = vrot.lane.b32.xlu0 %v2021_v52, %s1899_s21 }
 0x230   :  { %210 = vrot.lane.b32.xlu1 %v201_v53, %s1899_s21 }
 0x29a   :  { %v1773_v54 = vpop.permute.xlu1 %1772  ;;  %v1768_v55 = vpop.permute.xlu0 %1767 }
 0x29b   :  { %v1770_v56 = vunpack.i.h.bf16 %v1768_v55  ;;  %v1769_v57 = vunpack.i.l.bf16 %v1768_v55  ;;  %v1775_v58 = vunpack.i.h.bf16 %v1773_v54  ;;  %v1774_v59 = vunpack.i.l.bf16 %v1773_v54 }
 0x29d   :  { %v2024_v60 = vpack.c.bf16 %v1770_v56, %v1770_v56  ;;  %v2026_v61 = vpack.c.bf16 %v1769_v57, %v1769_v57  ;;  %v2030_v63 = vpack.c.bf16 %v1775_v58, %v1775_v58  ;;  %v2032_v2 = vpack.c.bf16 %v1774_v59, %v1774_v59 }
 0x29e   :  { %v1778_v62 = vpop.permute.xlu1 %1777  ;;  %v261_v9 = vpop.permute.xlu0 %260 }
 0x29f   :  { %309 = vrot.lane.b32.xlu1 %v2026_v61, %s1899_s21  ;;  %358 = vrot.lane.b32.xlu0 %v2024_v60, %s1899_s21  ;;  %v1780_v3 = vunpack.i.h.bf16 %v1778_v62  ;;  %v1779_v4 = vunpack.i.l.bf16 %v1778_v62  ;;  %v266_v10 = vsel %vm212_vm6, %v261_v9, 0 }
 0x2a1   :  { %v2037_v7 = vpack.c.bf16 %v1780_v3, %v1780_v3  ;;  %v2039_v8 = vpack.c.bf16 %v1779_v4, %v1779_v4 }
 0x2a2   :  { %v211_v5 = vpop.permute.xlu1 %210 }
 0x2a3   :  { %v217_v6 = vsel %vm212_vm6, %v211_v5, 0  ;;  %407 = vrot.lane.b32.xlu1 %v2032_v2, %s1899_s21  ;;  %456 = vrot.lane.b32.xlu0 %v2030_v63, %s1899_s21 }
 0x2a4   :  { %1650 = vmatpush3.bf16.xpose.msra.mxu0 %v217_v6 }
 0x2a5   :  { %1655 = vmatprep.subr.bf16.mxu0 %v1894_v15 }
 0x2a7   :  { %505 = vrot.lane.b32.xlu1 %v2039_v8, %s1899_s21  ;;  %554 = vrot.lane.b32.xlu0 %v2037_v7, %s1899_s21 }
 0x2ab   :  { %1652 = vmatmul.mubr.msk.bf16.vlgmr.msra.gmra.mrb[4].mxu0 %vm212_vm6, %v201_v53  ;;  %706 = vrot.lane.b32.xlu1 %v201_v53, %s1900_s2 }
 0x2ac   :  { %1656 = vmatpush3.bf16.xpose.msra.mxu0 %v266_v10  ;;  %1657 = vmatprep.mubr.msk.bf16.mxu0 %vm1895_vm1, %v1894_v15 }
 0x2ad   :  { %1667 = vmatprep.subr.bf16.mxu0 %v1894_v15 }
 0x2b3   :  { %1658 = vmatmul.mubr.msk.bf16.vlgmr.msra.gmra.mrb[8].mxu0 %vm212_vm6, %v2021_v52 }
 0x2b4   :  { %1669 = vmatprep.mubr.msk.bf16.mxu0 %vm1895_vm1, %v1894_v15 }
 0x311   :  { %v310_v11 = vpop.permute.xlu1 %309  ;;  %v359_v12 = vpop.permute.xlu0 %358 }
 0x312   :  { %v364_v13 = vsel %vm212_vm6, %v359_v12, 0  ;;  %v315_v14 = vsel %vm212_vm6, %v310_v11, 0 }
 0x313   :  { %1662 = vmatpush3.bf16.xpose.msra.mxu1 %v315_v14  ;;  %1668 = vmatpush3.bf16.xpose.msra.mxu0 %v364_v13 }
 0x314   :  { %1673 = vmatprep.subr.bf16.mxu1 %v1894_v15  ;;  %1679 = vmatprep.subr.bf16.mxu0 %v1894_v15 }
 0x315   :  { %v408_v16 = vpop.permute.xlu1 %407  ;;  %v457_v17 = vpop.permute.xlu0 %456 }
 0x316   :  { %v413_v18 = vsel %vm212_vm6, %v408_v16, 0  ;;  %v462_v19 = vsel %vm212_vm6, %v457_v17, 0 }
 0x319   :  { %v506_v20 = vpop.permute.xlu1 %505  ;;  %v555_v21 = vpop.permute.xlu0 %554 }
 0x31a   :  { %1664 = vmatmul.mubr.msk.bf16.vlgmr.msra.gmra.mrb[0].mxu1 %vm212_vm6, %v2026_v61  ;;  %1670 = vmatmul.mubr.msk.bf16.vlgmr.msra.gmra.mrb[12].mxu0 %vm212_vm6, %v2024_v60  ;;  %v511_v22 = vsel %vm212_vm6, %v506_v20, 0  ;;  %v560_v23 = vsel %vm212_vm6, %v555_v21, 0 }
 0x31b   :  { %1674 = vmatpush3.bf16.xpose.msra.mxu1 %v413_v18  ;;  %1680 = vmatpush3.bf16.xpose.msra.mxu0 %v462_v19 }
 0x31c   :  { %1675 = vmatprep.mubr.msk.bf16.mxu1 %vm1895_vm1, %v1894_v15  ;;  %1681 = vmatprep.mubr.msk.bf16.mxu0 %vm1895_vm1, %v1894_v15 }
 0x31d   :  { %1685 = vmatprep.subr.bf16.mxu1 %v1894_v15  ;;  %1691 = vmatprep.subr.bf16.mxu0 %v1894_v15  ;;  %v707_v24 = vpop.permute.xlu1 %706 }
 0x31e   :  { %v713_v25 = vsel %vm711_vm7, %v707_v24, 0 }
 0x322   :  { %1676 = vmatmul.mubr.msk.bf16.vlgmr.msra.gmra.mrb[4].mxu1 %vm212_vm6, %v2032_v2  ;;  %1682 = vmatmul.mubr.msk.bf16.vlgmr.msra.gmra.mrb[16].mxu0 %vm212_vm6, %v2030_v63 }
 0x323   :  { %1686 = vmatpush3.bf16.xpose.msra.mxu1 %v511_v22  ;;  %1692 = vmatpush3.bf16.xpose.msra.mxu0 %v560_v23 }
 0x324   :  { %1687 = vmatprep.mubr.msk.bf16.mxu1 %vm1895_vm1, %v1894_v15  ;;  %1693 = vmatprep.mubr.msk.bf16.mxu0 %vm1895_vm1, %v1894_v15 }
 0x325   :  { %1697 = vmatprep.subr.bf16.mxu1 %v1894_v15  ;;  %1703 = vmatprep.subr.bf16.mxu0 %v1894_v15 }
 0x32a   :  { %1688 = vmatmul.mubr.msk.bf16.vlgmr.msra.gmra.mrb[8].mxu1 %vm212_vm6, %v2039_v8  ;;  %1694 = vmatmul.mubr.msk.bf16.vlgmr.msra.gmra.mrb[20].mxu0 %vm212_vm6, %v2037_v7 }
 0x32b   :  { %1698 = vmatpush3.bf16.msra.mxu1 %v713_v25  ;;  %1705 = vmatprep.mubr.msk.bf16.mxu0 %vm1895_vm1, %v1894_v15 }
 0x32c   :  { %1699 = vmatprep.mubr.msk.bf16.mxu1 %vm1895_vm1, %v1894_v15  ;;  %1709 = vmatprep.subr.bf16.mxu1 %v1894_v15 }
 0x37e   :  { %v253_v26 = vpop.f32.mrb[4].mxu0 }
 0x37f   :  { %v2092_v27 = vmul.f32 0.35355338, %v253_v26  ;;  %v1653_v28 = vpop.f32.mrb[5].mxu0 }
 0x380   :  { %v256_v29 = vpop.f32.mrb[6].mxu0 }
 0x381   :  { %v1654_v30 = vpop.f32.mrb[7].mxu0  ;;  %v610_v31 = vsel %vm212_vm6, %v2092_v27, -inf }
 0x382   :  { %611 = vmax.xlane.f32.xlu1 %v610_v31 }
 0x386   :  { %v302_v32 = vpop.f32.mrb[8].mxu0 }
 0x387   :  { %v603_v33 = vmul.f32 0.35355338, %v302_v32  ;;  %v1659_v34 = vpop.f32.mrb[9].mxu0 }
 0x388   :  { %v305_v35 = vpop.f32.mrb[10].mxu0 }
 0x389   :  { %v1660_v36 = vpop.f32.mrb[11].mxu0  ;;  %v613_v37 = vsel %vm212_vm6, %v603_v33, -inf }
 0x38a   :  { %614 = vmax.xlane.f32.xlu0 %v613_v37 }
 0x3ed   :  { %v351_v38 = vpop.f32.mrb[0].mxu1  ;;  %v400_v39 = vpop.f32.mrb[12].mxu0 }
 0x3ee   :  { %v604_v40 = vmul.f32 0.35355338, %v351_v38  ;;  %v1665_v41 = vpop.f32.mrb[1].mxu1  ;;  %v1671_v42 = vpop.f32.mrb[13].mxu0  ;;  %v605_v45 = vmul.f32 0.35355338, %v400_v39 }
 0x3ef   :  { %v354_v43 = vpop.f32.mrb[2].mxu1  ;;  %v403_v44 = vpop.f32.mrb[14].mxu0 }
 0x3f0   :  { %v1666_v46 = vpop.f32.mrb[3].mxu1  ;;  %v1672_v47 = vpop.f32.mrb[15].mxu0  ;;  %v616_v48 = vsel %vm212_vm6, %v604_v40, -inf  ;;  %v619_v49 = vsel %vm212_vm6, %v605_v45, -inf }
 0x3f1   :  { %617 = vmax.xlane.f32.xlu0 %v616_v48 }
 0x3f5   :  { %v449_v50 = vpop.f32.mrb[4].mxu1  ;;  %620 = vmax.xlane.f32.xlu0 %v619_v49  ;;  %v498_v51 = vpop.f32.mrb[16].mxu0 }
 0x3f6   :  { %v606_v53 = vmul.f32 0.35355338, %v449_v50  ;;  %v2099_v54 = vmul.f32 0.35355338, %v498_v51  ;;  %v1677_v55 = vpop.f32.mrb[5].mxu1  ;;  %v1683_v56 = vpop.f32.mrb[17].mxu0 }
 0x3f7   :  { %v452_v57 = vpop.f32.mrb[6].mxu1  ;;  %v501_v58 = vpop.f32.mrb[18].mxu0 }
 0x3f8   :  { %v1678_v59 = vpop.f32.mrb[7].mxu1  ;;  %v1684_v62 = vpop.f32.mrb[19].mxu0  ;;  %v622_v3 = vsel %vm212_vm6, %v606_v53, -inf  ;;  %v625_v4 = vsel %vm212_vm6, %v2099_v54, -inf }
 0x3f9   :  { %623 = vmax.xlane.f32.xlu1 %v622_v3  ;;  %626 = vmax.xlane.f32.xlu0 %v625_v4 }
 0x3fd   :  { %v547_v5 = vpop.f32.mrb[8].mxu1  ;;  %v596_v6 = vpop.f32.mrb[20].mxu0 }
 0x3fe   :  { %v608_v9 = vmul.f32 0.35355338, %v547_v5  ;;  %v2104_v10 = vmul.f32 0.35355338, %v596_v6  ;;  %v1689_v11 = vpop.f32.mrb[9].mxu1  ;;  %v1695_v12 = vpop.f32.mrb[21].mxu0 }
 0x3ff   :  { %v550_v13 = vpop.f32.mrb[10].mxu1  ;;  %v599_v14 = vpop.f32.mrb[22].mxu0 }
 0x400   :  { %v1690_v16 = vpop.f32.mrb[11].mxu1  ;;  %v1696_v17 = vpop.f32.mrb[23].mxu0  ;;  %v628_v18 = vsel %vm212_vm6, %v608_v9, -inf  ;;  %v631_v19 = vsel %vm212_vm6, %v2104_v10, -inf }
 0x401   :  { %629 = vmax.xlane.f32.xlu1 %v628_v18  ;;  %632 = vmax.xlane.f32.xlu0 %v631_v19 }
 0x40f   :  { %v612_v22 = vpop.xlane.xlu1 %611 }
 0x410   :  { %v634_v23 = vsub.f32 %v2092_v27, %v612_v22 }
 0x412   :  { %803 = vrot.lane.b32.xlu1 %v2026_v61, %s1900_s2  ;;  %v642_v25 = vmul.f32 1.442695, %v634_v23 }
 0x416   :  { %851 = vrot.lane.b32.xlu1 %v2024_v60, %s1900_s2 }
 0x417   :  { %755 = vrot.lane.b32.xlu0 %v2021_v52, %s1900_s2  ;;  %v615_v20 = vpop.xlane.xlu0 %614 }
 0x418   :  { %v635_v21 = vsub.f32 %v603_v33, %v615_v20 }
 0x41a   :  { %v644_v24 = vmul.f32 1.442695, %v635_v21 }
 0x41c   :  { %1830 = vpow2.f32 %v644_v24 }
 0x41d   :  { %1832 = vpow2.f32 %v642_v25 }
 0x426   :  { %v1831_v26 = vpop.eup %1830 }
 0x427   :  { %v661_v28 = vsel %vm212_vm6, %v1831_v26, 0.0  ;;  %v2117_v29 = vpop.eup %1832 }
 0x428   :  { %v658_v60 = vsel %vm212_vm6, %v2117_v29, 0.0 }
 0x436   :  { %662 = vadd.xlane.f32.xlu0 %v661_v28 }
 0x43a   :  { %659 = vadd.xlane.f32.xlu1 %v658_v60 }
 0x44b   :  { %899 = vrot.lane.b32.xlu1 %v2032_v2, %s1900_s2 }
 0x47e   :  { %v618_v52 = vpop.xlane.xlu0 %617 }
 0x47f   :  { %v636_v61 = vsub.f32 %v604_v40, %v618_v52 }
 0x481   :  { %v646_v27 = vmul.f32 1.442695, %v636_v61 }
 0x482   :  { %v621_v30 = vpop.xlane.xlu0 %620 }
 0x483   :  { %1834 = vpow2.f32 %v646_v27  ;;  %v637_v31 = vsub.f32 %v605_v45, %v621_v30 }
 0x485   :  { %v648_v32 = vmul.f32 1.442695, %v637_v31 }
 0x486   :  { %v624_v33 = vpop.xlane.xlu1 %623  ;;  %v627_v36 = vpop.xlane.xlu0 %626 }
 0x487   :  { %1836 = vpow2.f32 %v648_v32  ;;  %v638_v34 = vsub.f32 %v606_v53, %v624_v33  ;;  %v639_v50 = vsub.f32 %v2099_v54, %v627_v36 }
 0x489   :  { %v650_v35 = vmul.f32 1.442695, %v638_v34  ;;  %v652_v51 = vmul.f32 1.442695, %v639_v50 }
 0x48b   :  { %1838 = vpow2.f32 %v650_v35 }
 0x48d   :  { %v2123_v37 = vpop.eup %1834 }
 0x48e   :  { %v630_v38 = vpop.xlane.xlu1 %629  ;;  %v633_v39 = vpop.xlane.xlu0 %632  ;;  %v664_v2 = vsel %vm212_vm6, %v2123_v37, 0.0 }
 0x48f   :  { %v640_v41 = vsub.f32 %v608_v9, %v630_v38  ;;  %665 = vadd.xlane.f32.xlu1 %v664_v2  ;;  %v641_v53 = vsub.f32 %v2104_v10, %v633_v39 }
 0x491   :  { %v2127_v40 = vpop.eup %1836  ;;  %v654_v42 = vmul.f32 1.442695, %v640_v41  ;;  %v656_v55 = vmul.f32 1.442695, %v641_v53 }
 0x492   :  { %v756_v43 = vpop.permute.xlu0 %755  ;;  %v667_v44 = vsel %vm212_vm6, %v2127_v40, 0.0  ;;  %v804_v56 = vpop.permute.xlu1 %803 }
 0x493   :  { %1840 = vpow2.f32 %v654_v42  ;;  %v761_v45 = vsel %vm711_vm7, %v756_v43, 0  ;;  %668 = vadd.xlane.f32.xlu0 %v667_v44  ;;  %v809_v12 = vsel %vm711_vm7, %v804_v56, 0 }
 0x494   :  { %1704 = vmatpush3.bf16.msra.mxu0 %v761_v45  ;;  %1842 = vpow2.f32 %v652_v51 }
 0x495   :  { %v2132_v46 = vpop.eup %1838  ;;  %1715 = vmatprep.subr.bf16.mxu0 %v1894_v15  ;;  %1844 = vpow2.f32 %v656_v55 }
 0x496   :  { %v670_v47 = vsel %vm212_vm6, %v2132_v46, 0.0  ;;  %v852_v57 = vpop.permute.xlu1 %851 }
 0x497   :  { %671 = vadd.xlane.f32.xlu1 %v670_v47  ;;  %v857_v9 = vsel %vm711_vm7, %v852_v57, 0 }
 0x49d   :  { %v2137_v48 = vpop.eup %1840 }
 0x49e   :  { %v676_v49 = vsel %vm212_vm6, %v2137_v48, 0.0  ;;  %v2147_v59 = vpop.eup %1842 }
 0x49f   :  { %677 = vadd.xlane.f32.xlu1 %v676_v49  ;;  %v2151_v3 = vpop.eup %1844 }
 0x4a9   :  { %947 = vrot.lane.b32.xlu0 %v2030_v63, %s1900_s2  ;;  %v673_v63 = vsel %vm212_vm6, %v2147_v59, 0.0 }
 0x4b0   :  { %995 = vrot.lane.b32.xlu1 %v2039_v8, %s1900_s2  ;;  %v679_v8 = vsel %vm212_vm6, %v2151_v3, 0.0 }
 0x4c3   :  { %v663_v58 = vpop.xlane.xlu0 %662 }
 0x4c4   :  { %1846 = vrcp.f32 %v663_v58 }
 0x4c7   :  { %v660_v62 = vpop.xlane.xlu1 %659 }
 0x4c8   :  { %1848 = vrcp.f32 %v660_v62  ;;  %674 = vadd.xlane.f32.xlu0 %v673_v63 }
 0x4cb   :  { %v900_v13 = vpop.permute.xlu1 %899 }
 0x4cc   :  { %680 = vadd.xlane.f32.xlu0 %v679_v8  ;;  %v905_v22 = vsel %vm711_vm7, %v900_v13, 0 }
 0x4ce   :  { %v1847_v54 = vpop.eup %1846 }
 0x4cf   :  { %v691_v4 = vmul.f32 %v1847_v54, %v1831_v26 }
 0x4d1   :  { %v699_v5 = vpack.c.bf16 %v691_v4, %v691_v4 }
 0x4d2   :  { %v1849_v6 = vpop.eup %1848 }
 0x4d3   :  { %v690_v10 = vmul.f32 %v1849_v6, %v2117_v29  ;;  %1706 = vmatmul.mubr.msk.bf16.vlgmr.msra.gmra.mrb[24].mxu0 %vm212_vm6, %v699_v5 }
 0x4d4   :  { %1716 = vmatpush3.bf16.msra.mxu0 %v857_v9  ;;  %1717 = vmatprep.mubr.msk.bf16.mxu0 %vm1895_vm1, %v1894_v15  ;;  %v1798_v9 = vld [vmem:[%s2328_s3] sm:$0xff]  }
 0x4d5   :  { %v698_v11 = vpack.c.bf16 %v690_v10, %v690_v10  ;;  %1727 = vmatprep.subr.bf16.mxu0 %v1894_v15  ;;  %v1799_v10 = vld [vmem:[%s2328_s3 + $0x8] sm:$0xff]  }
 0x4d7   :  { %1700 = vmatmul.mubr.msk.bf16.vlgmr.msra.gmra.mrb[12].mxu1 %vm212_vm6, %v698_v11 }
 0x4d8   :  { %1710 = vmatpush3.bf16.msra.mxu1 %v809_v12  ;;  %1711 = vmatprep.mubr.msk.bf16.mxu1 %vm1895_vm1, %v1894_v15 }
 0x4d9   :  { %1721 = vmatprep.subr.bf16.mxu1 %v1894_v15 }
 0x4e2   :  { %1043 = vrot.lane.b32.xlu0 %v2037_v7, %s1900_s2 }
 0x51c   :  { %v666_v14 = vpop.xlane.xlu1 %665 }
 0x51d   :  { %1850 = vrcp.f32 %v666_v14 }
 0x520   :  { %v669_v16 = vpop.xlane.xlu0 %668 }
 0x521   :  { %1852 = vrcp.f32 %v669_v16 }
 0x524   :  { %v672_v17 = vpop.xlane.xlu1 %671  ;;  %v948_v7 = vpop.permute.xlu0 %947 }
 0x525   :  { %1854 = vrcp.f32 %v672_v17  ;;  %v953_v29 = vsel %vm711_vm7, %v948_v7, 0 }
 0x527   :  { %v1851_v18 = vpop.eup %1850 }
 0x528   :  { %v692_v19 = vmul.f32 %v1851_v18, %v2123_v37 }
 0x52a   :  { %v700_v20 = vpack.c.bf16 %v692_v19, %v692_v19 }
 0x52b   :  { %v1853_v21 = vpop.eup %1852 }
 0x52c   :  { %v693_v23 = vmul.f32 %v1853_v21, %v2127_v40  ;;  %1712 = vmatmul.mubr.msk.bf16.vlgmr.msra.gmra.mrb[16].mxu1 %vm212_vm6, %v700_v20  ;;  %v678_v24 = vpop.xlane.xlu1 %677 }
 0x52d   :  { %1722 = vmatpush3.bf16.msra.mxu1 %v905_v22  ;;  %1856 = vrcp.f32 %v678_v24  ;;  %1723 = vmatprep.mubr.msk.bf16.mxu1 %vm1895_vm1, %v1894_v15 }
 0x52e   :  { %v701_v25 = vpack.c.bf16 %v693_v23, %v693_v23  ;;  %1733 = vmatprep.subr.bf16.mxu1 %v1894_v15 }
 0x52f   :  { %v1855_v26 = vpop.eup %1854 }
 0x530   :  { %v694_v28 = vmul.f32 %v1855_v26, %v2132_v46  ;;  %1718 = vmatmul.mubr.msk.bf16.vlgmr.msra.gmra.mrb[28].mxu0 %vm212_vm6, %v701_v25  ;;  %v996_v60 = vpop.permute.xlu1 %995 }
 0x531   :  { %1728 = vmatpush3.bf16.msra.mxu0 %v953_v29  ;;  %1729 = vmatprep.mubr.msk.bf16.mxu0 %vm1895_vm1, %v1894_v15  ;;  %v1001_v61 = vsel %vm711_vm7, %v996_v60, 0 }
 0x532   :  { %v702_v52 = vpack.c.bf16 %v694_v28, %v694_v28  ;;  %1739 = vmatprep.subr.bf16.mxu0 %v1894_v15 }
 0x534   :  { %1724 = vmatmul.mubr.msk.bf16.vlgmr.msra.gmra.mrb[20].mxu1 %vm212_vm6, %v702_v52 }
 0x535   :  { %1734 = vmatpush3.bf16.msra.mxu1 %v1001_v61  ;;  %1735 = vmatprep.mubr.msk.bf16.mxu1 %vm1895_vm1, %v1894_v15 }
 0x536   :  { %1745 = vmatprep.subr.bf16.mxu1 %v1894_v15 }
 0x537   :  { %v1857_v27 = vpop.eup %1856 }
 0x538   :  { %v696_v30 = vmul.f32 %v1857_v27, %v2137_v48 }
 0x53a   :  { %v704_v31 = vpack.c.bf16 %v696_v30, %v696_v30 }
 0x53c   :  { %1736 = vmatmul.mubr.msk.bf16.vlgmr.msra.gmra.mrb[24].mxu1 %vm212_vm6, %v704_v31 }
 0x53d   :  { %1749 = vmatprep.mubr.msk.bf16.mxu1 %vm1895_vm1, %v1894_v15  ;;  %1746 = vmatpush3.bf16.msra.mxu1 %v1798_v9  ;;  %v1816_v9 = vld [vmem:[%s2336_s11 + $0x68] sm:$0xff]  }
 0x53e   :  { %1747 = vmatprep.subr.bf16.mxu1 %v1894_v15 }
 0x541   :  { %1748 = vmatpush3.bf16.msra.mxu1 %v1799_v10 }
 0x555   :  { %v675_v32 = vpop.xlane.xlu0 %674 }
 0x556   :  { %1858 = vrcp.f32 %v675_v32 }
 0x559   :  { %v681_v33 = vpop.xlane.xlu0 %680 }
 0x55a   :  { %1860 = vrcp.f32 %v681_v33  ;;  %v1553_v33 = vld [vmem:[%s2329_s4] ss:$0 sm:$0xff] }
 0x55d   :  { %v1044_v36 = vpop.permute.xlu0 %1043 }
 0x55e   :  { %v1049_v39 = vsel %vm711_vm7, %v1044_v36, 0 }
 0x560   :  { %v1859_v34 = vpop.eup %1858 }
 0x561   :  { %v695_v35 = vmul.f32 %v1859_v34, %v2147_v59 }
 0x563   :  { %v703_v37 = vpack.c.bf16 %v695_v35, %v695_v35 }
 0x564   :  { %v1861_v38 = vpop.eup %1860 }
 0x565   :  { %1730 = vmatmul.mubr.msk.bf16.vlgmr.msra.gmra.mrb[32].mxu0 %vm212_vm6, %v703_v37  ;;  %v697_v2 = vmul.f32 %v1861_v38, %v2151_v3 }
 0x566   :  { %1740 = vmatpush3.bf16.msra.mxu0 %v1049_v39  ;;  %1741 = vmatprep.mubr.msk.bf16.mxu0 %vm1895_vm1, %v1894_v15 }
 0x567   :  { %v705_v41 = vpack.c.bf16 %v697_v2, %v697_v2 }
 0x56d   :  { %1742 = vmatmul.mubr.msk.bf16.vlgmr.msra.gmra.mrb[36].mxu0 %vm212_vm6, %v705_v41 }
 0x5a6   :  { %v797_v40 = vpop.f32.mrb[24].mxu0 }
 0x5a7   :  { %v1707_v42 = vpop.f32.mrb[25].mxu0 }
 0x5a8   :  { %v800_v43 = vpop.f32.mrb[26].mxu0 }
 0x5a9   :  { %v1708_v44 = vpop.f32.mrb[27].mxu0 }
 0x5aa   :  { %v749_v45 = vpop.f32.mrb[12].mxu1 }
 0x5ab   :  { %v1701_v46 = vpop.f32.mrb[13].mxu1 }
 0x5ac   :  { %v752_v47 = vpop.f32.mrb[14].mxu1 }
 0x5ad   :  { %v1702_v48 = vpop.f32.mrb[15].mxu1 }
 0x5ff   :  { %v845_v49 = vpop.f32.mrb[16].mxu1 }
 0x600   :  { %v1713_v50 = vpop.f32.mrb[17].mxu1 }
 0x601   :  { %v848_v51 = vpop.f32.mrb[18].mxu1 }
 0x602   :  { %v1714_v53 = vpop.f32.mrb[19].mxu1  ;;  %v1800_v51 = vld [vmem:[%s2334_s9] ss:$8 sps:$4 sm:$0xff]  }
 0x603   :  { %v893_v55 = vpop.f32.mrb[28].mxu0  ;;  %v1802_v53 = vld [vmem:[%s2334_s9 + $0x4] ss:$8 sps:$4 sm:$0xff]  }
 0x604   :  { %v1781_v56 = vpack.i.bf16 %v893_v55, %v845_v49  ;;  %v1719_v57 = vpop.f32.mrb[29].mxu0  ;;  %v1805_v55 = vld [vmem:[%s2334_s9 + $0x14] ss:$8 sps:$4 sm:$0xff]   ;;  %1287 = vmatprep.subr.bf16.mxu0 %v1802_v53 }
 0x605   :  { %v896_v58 = vpop.f32.mrb[30].mxu0  ;;  %1288 = vmatpush1.bf16.msra.mxu0 %v1800_v51  ;;  %v1803_v57 = vld [vmem:[%s2334_s9 + $0x10] ss:$8 sps:$4 sm:$0xff]  }
 0x606   :  { %1782 = vrot.lane.b32.xlu1 %v1781_v56, %s1901_s22  ;;  %v1720_v59 = vpop.f32.mrb[31].mxu0  ;;  %v1904_v56 = vmov 0   ;;  %1289 = vmatprep.subr.bf16.mxu0 %v1805_v55  ;;  %v1806_v58 = vld [vmem:[%s2336_s11 + $0x40] sm:$0xff]  }
 0x607   :  { %v941_v62 = vpop.f32.mrb[20].mxu1  ;;  %1319 = vmatprep.mubr.bf16.mxu0 %v1904_v56  ;;  %v1807_v59 = vld [vmem:[%s2336_s11] sm:$0xff]   ;;  %1619 = vmatprep.subr.bf16.mxu1 %v1806_v58 }
 0x608   :  { %v1725_v63 = vpop.f32.mrb[21].mxu1 }
 0x609   :  { %v944_v3 = vpop.f32.mrb[22].mxu1  ;;  %1290 = vmatpush1.bf16.msra.mxu0 %v1803_v57  ;;  %v1809_v63 = vld [vmem:[%s2336_s11 + $0x8] sm:$0xff]  }
 0x60a   :  { %v1726_v8 = vpop.f32.mrb[23].mxu1  ;;  %v1810_v3 = vld [vmem:[%s2336_s11 + $0x50] sm:$0xff]  }
 0x60b   :  { %v1811_v8 = vld [vmem:[%s2336_s11 + $0x10] sm:$0xff]  }
 0x60f   :  { %v1037_v54 = vpop.f32.mrb[24].mxu1 }
 0x610   :  { %v1737_v4 = vpop.f32.mrb[25].mxu1 }
 0x611   :  { %v1040_v5 = vpop.f32.mrb[26].mxu1  ;;  %v1813_v4 = vld [vmem:[%s2336_s11 + $0x18] sm:$0xff]  }
 0x612   :  { %v1738_v6 = vpop.f32.mrb[27].mxu1  ;;  %v1814_v5 = vld [vmem:[%s2336_s11 + $0x60] sm:$0xff]  }
 0x613   :  { %v1815_v6 = vld [vmem:[%s2336_s11 + $0x20] sm:$0xff]  }
 0x638   :  { %v989_v11 = vpop.f32.mrb[32].mxu0 }
 0x639   :  { %v1786_v12 = vpack.i.bf16 %v989_v11, %v941_v62  ;;  %v1731_v13 = vpop.f32.mrb[33].mxu0  ;;  %v1808_v62 = vld [vmem:[%s2336_s11 + $0x48] sm:$0xff]  }
 0x63a   :  { %v992_v14 = vpop.f32.mrb[34].mxu0 }
 0x63b   :  { %1787 = vrot.lane.b32.xlu0 %v1786_v12, %s1902_s27  ;;  %v1732_v16 = vpop.f32.mrb[35].mxu0  ;;  %s1905_s27 = smov [#allocation2]  }
 0x640   :  { %v1085_v17 = vpop.f32.mrb[36].mxu0 }
 0x641   :  { %v1791_v18 = vpack.i.bf16 %v1085_v17, %v1037_v54  ;;  %v1743_v19 = vpop.f32.mrb[37].mxu0  ;;  %v1812_v54 = vld [vmem:[%s2336_s11 + $0x58] sm:$0xff]  }
 0x642   :  { %v1088_v20 = vpop.f32.mrb[38].mxu0 }
 0x643   :  { %1792 = vrot.lane.b32.xlu1 %v1791_v18, %s1903_s28  ;;  %v1744_v21 = vpop.f32.mrb[39].mxu0  ;;  %s1520_s28 = sshll.u32 %s1905_s27, 4  ;;  %s1521_s28 = int_to_ptr.vmem [resolvable:$true] %s1520_s28 }
 0x644   :  { %s1870_s3 = scalar_lea.vmem %s1521_s28, 256  ;;  %p1875_p1 = scmp.lt.s32.totalorder %s1521_s28, %s1521_s28 }
 0x645   :  { %p1871_p0 = scmp.ne.s32.totalorder %s1521_s28, %s1870_s3  ;;  %p1876_p2 = scmp.lt.s32.totalorder %s1870_s3, %s1870_s3 }
 0x647   :  { %p1877_p3 = por %p1876_p2, %p1875_p1 }
 0x649   :  { %p1878_p4 = pnand %p1877_p3, %p1871_p0 }
 0x678   :  { %v1783_v15 = vpop.permute.xlu1 %1782 }
 0x679   :  { %v1785_v23 = vunpack.i.h.bf16 %v1783_v15  ;;  %v1784_v24 = vunpack.i.l.bf16 %v1783_v15 }
 0x67b   :  { %v1116_v28 = vsel %vm212_vm6, %v797_v40, %v1785_v23  ;;  %v1115_v29 = vsel %vm212_vm6, %v749_v45, %v1784_v24 }
 0x6ad   :  { %v1788_v22 = vpop.permute.xlu0 %1787 }
 0x6ae   :  { %v1790_v7 = vunpack.i.h.bf16 %v1788_v22  ;;  %v1789_v25 = vunpack.i.l.bf16 %v1788_v22 }
 0x6b0   :  { %v1119_v61 = vsel %vm1117_vm8, %v1116_v28, %v1790_v7  ;;  %v1118_v27 = vsel %vm1117_vm8, %v1115_v29, %v1789_v25  ;;  %v1557_v25 = vld [vmem:[%s2332_s7] ss:$0 sm:$0xff] }
 0x6b5   :  { %v1793_v26 = vpop.permute.xlu1 %1792 }
 0x6b6   :  { %v1795_v60 = vunpack.i.h.bf16 %v1793_v26  ;;  %v1794_v52 = vunpack.i.l.bf16 %v1793_v26 }
 0x6b8   :  { %v1122_v30 = vsel %vm1120_vm9, %v1119_v61, %v1795_v60  ;;  %v1121_v31 = vsel %vm1120_vm9, %v1118_v27, %v1794_v52  ;;  %v1558_v61 = vld [vmem:[%s2333_s8] ss:$0 sm:$0xff] }
 0x6b9   :  { %v1123_v32 = vpack.c.bf16 %v1122_v30, %v1121_v31 }
 0x6bb   :  { %1750 = vmatmul.mubr.msk.bf16.vlgmr.msra.gmra.mrb[28].mxu1 %vm56_vm0, %v1123_v32 }
 0x6bc   :  { %1620 = vmatpush3.bf16.msra.mxu1 %v1807_v59 }
 0x6bd   :  { %1621 = vmatprep.subr.bf16.mxu1 %v1808_v62 }
 0x6c0   :  { %1622 = vmatpush3.bf16.msra.mxu1 %v1809_v63  ;;  %v1564_v63 = vld [vmem:[%s2337_s12] ss:$0 sm:$0xff] }
 0x6c1   :  { %1623 = vmatprep.subr.bf16.mxu1 %v1810_v3 }
 0x6c4   :  { %1624 = vmatpush3.bf16.msra.mxu1 %v1811_v8 }
 0x6c5   :  { %1625 = vmatprep.subr.bf16.mxu1 %v1812_v54 }
 0x6c8   :  { %1626 = vmatpush3.bf16.msra.mxu1 %v1813_v4 }
 0x6c9   :  { %1627 = vmatprep.subr.bf16.mxu1 %v1814_v5 }
 0x6cc   :  { %1628 = vmatpush3.bf16.msra.mxu1 %v1815_v6 }
 0x6cd   :  { %1629 = vmatprep.subr.bf16.mxu1 %v1816_v9 }
 0x78e   :  { %v1183_v34 = vpop.f32.mrb[28].mxu1 }
 0x78f   :  { %v1184_v35 = vadd.f32 %v1553_v33, %v1183_v34  ;;  %v1751_v36 = vpop.f32.mrb[29].mxu1  ;;  %v1818_v34 = vld [vmem:[%s2336_s11 + $0x70] sm:$0xff]  }
 0x790   :  { %v1186_v37 = vpop.f32.mrb[30].mxu1  ;;  %v1820_v36 = vld [vmem:[%s2336_s11 + $0x78] sm:$0xff]  }
 0x791   :  { %v2212_v38 = vadd.f32 %v1184_v35, %v1980_v0  ;;  %v1187_v39 = vadd.f32 %v1553_v33, %v1186_v37  ;;  %v1752_v2 = vpop.f32.mrb[31].mxu1  ;;  %v1817_v33 = vld [vmem:[%s2336_s11 + $0x28] sm:$0xff]   ;;  %v1819_v35 = vld [vmem:[%s2336_s11 + $0x30] sm:$0xff]   ;;  %v1821_v37 = vld [vmem:[%s2336_s11 + $0x38] sm:$0xff]  }
 0x792   :  { %1630 = vmatpush3.bf16.msra.mxu1 %v1817_v33 }
 0x793   :  { %v2215_v41 = vadd.f32 %v1187_v39, %v1985_v1  ;;  %v1192_v40 = vsel %vm56_vm0, %v2212_v38, 0.0  ;;  %1631 = vmatprep.subr.bf16.mxu1 %v1818_v34  ;;  %v1254_v39 = vlaneseq }
 0x794   :  { %1193 = vadd.xlane.f32.xlu0 %v1192_v40 }
 0x795   :  { %v1195_v42 = vsel %vm56_vm0, %v2215_v41, 0.0  ;;  %v1255_v2 = vshrl.u32 %v1254_v39, 7 }
 0x796   :  { %1196 = vadd.xlane.f32.xlu1 %v1195_v42  ;;  %1632 = vmatpush3.bf16.msra.mxu1 %v1819_v35  ;;  %v54_v42 = vld [vmem:[%s2335_s10] sm:$0x3] }
 0x797   :  { %1633 = vmatprep.subr.bf16.mxu1 %v1820_v36  ;;  %v1256_v40 = vsub.s32 0, %v1255_v2 }
 0x79a   :  { %1634 = vmatpush3.bf16.msra.mxu1 %v1821_v37 }
 0x821   :  { %v1194_v43 = vpop.xlane.xlu0 %1193 }
 0x822   :  { %v1198_v44 = vmul.f32 0.03125, %v1194_v43  ;;  %v1260_v43 = vsub.s32 1, %v1255_v2 }
 0x823   :  { %v1197_v45 = vpop.xlane.xlu1 %1196 }
 0x824   :  { %v2222_v46 = vsub.f32 %v2212_v38, %v1198_v44  ;;  %v1199_v0 = vmul.f32 0.03125, %v1197_v45  ;;  %v1257_v44 = vrot.slane %v54_v42, %v1256_v40  ;;  %v1261_v45 = vrot.slane %v54_v42, %v1260_v43 }
 0x826   :  { %v2225_v47 = vsub.f32 %v2215_v41, %v1199_v0  ;;  %v1202_v1 = vmul.f32 %v2222_v46, %v2222_v46  ;;  %v1232_v28 = vmul.f32 %v1557_v25, %v2222_v46 }
 0x828   :  { %v1204_v48 = vsel %vm56_vm0, %v1202_v1, 0.0  ;;  %v1203_v49 = vmul.f32 %v2225_v47, %v2225_v47  ;;  %v1233_v29 = vmul.f32 %v1557_v25, %v2225_v47 }
 0x829   :  { %1205 = vadd.xlane.f32.xlu0 %v1204_v48 }
 0x82a   :  { %v1207_v50 = vsel %vm56_vm0, %v1203_v49, 0.0 }
 0x82d   :  { %1208 = vadd.xlane.f32.xlu0 %v1207_v50 }
 0x8b6   :  { %v1206_v10 = vpop.xlane.xlu0 %1205 }
 0x8b7   :  { %v1210_v11 = vmul.f32 0.032258064, %v1206_v10 }
 0x8b9   :  { %1862 = vrsqrt.f32 %v1210_v11  ;;  %vm1214_vm10 = vcmp.eq.f32.partialorder %v1210_v11, inf  ;;  %v1217_v17 = vand.u32 2147483648, %v1210_v11  ;;  %vm1216_vm11 = vcmp.eq.f32.partialorder %v1210_v11, 0.0 }
 0x8ba   :  { %v1209_v12 = vpop.xlane.xlu0 %1208 }
 0x8bb   :  { %v1211_v13 = vmul.f32 0.032258064, %v1209_v12 }
 0x8bd   :  { %1864 = vrsqrt.f32 %v1211_v13  ;;  %vm1221_vm12 = vcmp.eq.f32.partialorder %v1211_v13, inf  ;;  %v1224_v22 = vand.u32 2147483648, %v1211_v13  ;;  %vm1223_vm13 = vcmp.eq.f32.partialorder %v1211_v13, 0.0 }
 0x8c3   :  { %v1863_v14 = vpop.eup %1862 }
 0x8c4   :  { %v1213_v16 = vmul.f32 %v1863_v14, %v1210_v11 }
 0x8c6   :  { %v1215_v18 = vsel %vm1214_vm10, %v1210_v11, %v1213_v16 }
 0x8c7   :  { %v1865_v19 = vpop.eup %1864  ;;  %v1218_v20 = vsel %vm1216_vm11, %v1217_v17, %v1215_v18 }
 0x8c8   :  { %v1234_v21 = vadd.f32 1e-06, %v1218_v20  ;;  %v1220_v15 = vmul.f32 %v1865_v19, %v1211_v13 }
 0x8ca   :  { %1866 = vrcp.f32 %v1234_v21  ;;  %v1222_v23 = vsel %vm1221_vm12, %v1211_v13, %v1220_v15 }
 0x8cb   :  { %v1225_v24 = vsel %vm1223_vm13, %v1224_v22, %v1222_v23 }
 0x8cc   :  { %v1235_v7 = vadd.f32 1e-06, %v1225_v24 }
 0x8ce   :  { %1868 = vrcp.f32 %v1235_v7 }
 0x8d4   :  { %v1867_v26 = vpop.eup %1866 }
 0x8d5   :  { %v1237_v60 = vmul.f32 %v1867_v26, %v1232_v28 }
 0x8d7   :  { %v1246_v30 = vadd.f32 %v1558_v61, %v1237_v60 }
 0x8d8   :  { %v1869_v52 = vpop.eup %1868 }
 0x8d9   :  { %v1239_v27 = vmul.f32 %v1869_v52, %v1233_v29 }
 0x8db   :  { %v1247_v31 = vadd.f32 %v1558_v61, %v1239_v27 }
 0x8dd   :  { %v1248_v32 = vpack.c.bf16 %v1247_v31, %v1246_v30 }
 0x8df   :  { %1563 = vmatmul.mubr.msk.bf16.vlgmr.msra.gmra.mrb[40].mxu0 %vm56_vm0, %v1248_v32 }
 0x9b2   :  { %v1321_v46 = vpop.f32.mrb[40].mxu0 }
 0x9b3   :  { %v1322_v0 = vadd.f32 %v1321_v46, %v1257_v44  ;;  %v1323_v47 = vpop.f32.mrb[41].mxu0 }
 0x9b4   :  { %v1324_v1 = vadd.f32 %v1323_v47, %v1261_v45  ;;  %v1325_v48 = vpop.f32.mrb[42].mxu0 }
 0x9b5   :  { %v1326_v49 = vadd.f32 %v1325_v48, %v1257_v44  ;;  %v1327_v50 = vpop.f32.mrb[43].mxu0  ;;  %v1330_v53 = vmax.f32 %v1322_v0, 0.0 }
 0x9b6   :  { %v1328_v51 = vadd.f32 %v1327_v50, %v1261_v45  ;;  %v1331_v56 = vmax.f32 %v1324_v1, 0.0 }
 0x9b7   :  { %v1332_v55 = vmax.f32 %v1326_v49, 0.0 }
 0x9b8   :  { %v1333_v57 = vmax.f32 %v1328_v51, 0.0 }
 0x9b9   :  { %v1334_v58 = vpack.c.bf16 %v1332_v55, %v1330_v53 }
 0x9ba   :  { %v1335_v59 = vpack.c.bf16 %v1333_v57, %v1331_v56 }
 0x9bc   :  { %1502 = vmatprep.mubr.bf16.mxu1 %v1335_v59 }
 0x9bd   :  { %1503 = vmatmul.mubr.bf16.vlgmr.msra.gmra.mrb[32].mxu1 %v1334_v58 }
 0xa90   :  { %v1635_v62 = vpop.f32.mrb[32].mxu1 }
 0xa91   :  { %v1636_v3 = vpop.f32.mrb[33].mxu1 }
 0xa92   :  { %v1637_v8 = vadd.f32 %v1636_v3, %v1635_v62  ;;  %v1638_v54 = vpop.f32.mrb[34].mxu1 }
 0xa93   :  { %v1639_v4 = vpop.f32.mrb[35].mxu1 }
 0xa94   :  { %v1505_v5 = vadd.f32 %v1637_v8, %v1564_v63  ;;  %v1640_v6 = vadd.f32 %v1639_v4, %v1638_v54 }
 0xa96   :  { %v1511_v9 = vadd.f32 %v1505_v5, %v2212_v38  ;;  %v1508_v10 = vadd.f32 %v1640_v6, %v1564_v63 }
 0xa98   :  { %1513 = vst.msk [vmem:[#allocation2] sm:$0xff] %vm56_vm0, %v1511_v9  ;;  %v1512_v11 = vadd.f32 %v1508_v10, %v2215_v41 }
 0xa9a   :  { %1514 = vst.msk [vmem:[#allocation2 + $0x8] sm:$0xff] %vm56_vm0, %v1512_v11 }
 0xa9b   :  { %1881 = shalt.err (!%p1878_p4)
}
 0xa9c   :  { %s1882_s4 = scalar_lea.hbm %s2338_s13, 256 }
 0xa9d   :  { %p1883_p5 = scmp.ne.s32.totalorder %s2338_s13, %s1882_s4  ;;  %p1886_p6 = scmp.lt.u32.totalorder %s1882_s4, %s2338_s13 }
 0xa9f   :  { %p1888_p7 = pnand %p1886_p6, %p1883_p5 }
 0xaa1   :  { %1891 = shalt.err (!%p1888_p7)
}
 0xaa2   :  { %s1906_s15 = smov 128  }
 0xaa3   :  { %1526 = dma.vmem_to_hbm [thread:$0]  %s1521_s28, 256, %s2338_s13, [#allocation3], %s1906_s15, %s1906_s15, %s1901_s22  }
 0xaa4   :  { %1892 = dma.done.wait [#allocation3], 256  }
 0xaa5   :  { %1893 = vsyncadd [#allocation3], 4294967040 }
 0xaa6   :  { %1530 = vsyncpa [#allocation3], 1 }

</bundles_post_ra>
